<compile_context>
chip_gen: v7x
topology: tpu7x:2x2x1
jax: 0.10.0
libtpu: 0.0.40
codegen_flags: <defaults>
</compile_context>

<pallas_src>
import functools

import jax
import jax.numpy as jnp
from jax import lax
from jax.experimental import pallas as pl
from jax.experimental.pallas import tpu as pltpu

SMOOTHING = 0.1
_LANE = 128


def _round_up(x, m):
    return ((x + m - 1) // m) * m


def _vmem_budgets():
    """Generation-aware VMEM limits: ~48 MiB on v7x (64 MiB/TC), ~96 MiB on v5e/v6e."""
    cap = 64 * 1024 * 1024  # conservative fallback (v7x per-TC physical VMEM)
    try:
        info_cap = int(pltpu.get_tpu_info().vmem_capacity_bytes)
        if info_cap > 0:
            cap = info_cap
    except Exception:
        pass
    vmem_limit = min((cap * 3) // 4, 96 * 1024 * 1024)
    tile_budget = (vmem_limit * 2) // 3   # input double-buffer + f32 temporaries
    return int(vmem_limit), int(tile_budget)


def _choose_tile_n(n_rows, c_pad, itemsize, tile_budget_bytes):
    # ~2x double-buffered input block + ~4 live (tile_n, c_pad) f32 temporaries.
    bytes_per_row = c_pad * (2 * itemsize + 4 * 4)
    mult = 8 if itemsize >= 4 else 16            # keep sublane-packed vregs full
    tile = tile_budget_bytes // max(bytes_per_row, 1)
    tile = max(mult, (tile // mult) * mult)
    # v7x has 2 TensorCores and the grid axis is 'parallel': make sure the batch
    # splits into at least 2 tiles (and bias towards an even tile count) so both
    # cores get work. Per-tile DMA stays multi-MiB at realistic shapes.
    if n_rows > mult:
        tile = min(tile, _round_up(pl.cdiv(n_rows, 2), mult))
    tile = min(tile, _round_up(n_rows, mult))    # never bigger than the padded batch
    num_tiles = pl.cdiv(n_rows, tile)
    if num_tiles > 1 and num_tiles % 2 == 1:
        tile_even = _round_up(pl.cdiv(n_rows, num_tiles + 1), mult)
        if tile_even >= mult:
            tile = min(tile, tile_even)
    return int(tile)


def _ls_ce_kernel(x_ref, tgt_ref, out_ref, *, smoothing, confidence,
                  num_classes, c_pad, n_rows, tile_n, padded):
    i = pl.program_id(0)

    x = x_ref[...].astype(jnp.float32)                         # (TN, Cp)
    m = jnp.max(x, axis=-1, keepdims=True)                     # row max (stability)
    shifted = x - m
    # TODO(synk): for vocab-scale C (Cp >~ 250k f32 rows on v7x's 64 MiB VMEM) add a
    # class-axis grid dimension ('arbitrary', innermost) with an online max/LSE
    # accumulator instead of shrinking tile_n toward 8 rows.
    lse = jnp.log(jnp.sum(jnp.exp(shifted), axis=-1, keepdims=True))   # (TN, 1)

    # (1, Cp) class-id row; compares broadcast against it (no full-tile int32 iota).
    cls_row = lax.broadcasted_iota(jnp.int32, (1, c_pad), 1)
    if padded:
        # padded lanes carry huge-negative logits: exclude them from the smoothing mean
        base_w = jnp.where(cls_row < num_classes, smoothing / num_classes, 0.0)
    else:
        base_w = jnp.full((1, c_pad), smoothing / num_classes, jnp.float32)
    tgt = tgt_ref[...]                                          # (TN, 1) int32
    # loss = conf*(lse - s_tgt) + smooth*(lse - sum(s)/C) = lse - sum(s * w)
    w = jnp.where(cls_row == tgt, confidence, 0.0) + base_w     # (TN, Cp)
    loss = lse - jnp.sum(shifted * w, axis=-1, keepdims=True)   # (TN, 1)

    # zero out rows past the true batch size (ragged last tile reads garbage HBM;
    # keep this mask AFTER the loss algebra so NaN/Inf garbage never escapes)
    row_idx = i * tile_n + lax.broadcasted_iota(jnp.int32, loss.shape, 0)
    loss = jnp.where(row_idx < n_rows, loss, 0.0)

    tile_sum = jnp.sum(loss)                                    # one reduce per tile
    out_ref[...] = jnp.broadcast_to(tile_sum, out_ref.shape).astype(jnp.float32)


def label_smoothing_cross_entropy(x, target, smoothing=SMOOTHING, tile_n=None):
    """x: (N, C) float logits, target: (N,) int class indices. Returns scalar f32 loss."""
    N, C = x.shape
    confidence = 1.0 - smoothing
    vmem_limit_bytes, tile_budget_bytes = _vmem_budgets()

    # Lane-align the class axis: pad with a large-negative finite logit so padded
    # lanes contribute exp(~0) to the lse and are excluded from the smoothing mean.
    c_pad = _round_up(C, _LANE)
    padded = c_pad != C
    if padded:
        pad_val = -6.0e4 if x.dtype == jnp.float16 else -1e30   # f16 would overflow -1e30
        x = jnp.pad(x, ((0, 0), (0, c_pad - C)), constant_values=pad_val)

    if tile_n is None:
        tile_n = _choose_tile_n(N, c_pad, x.dtype.itemsize, tile_budget_bytes)
    num_tiles = pl.cdiv(N, tile_n)

    tgt2d = target.astype(jnp.int32).reshape(N, 1)
    kernel = functools.partial(
        _ls_ce_kernel, smoothing=float(smoothing), confidence=float(confidence),
        num_classes=C, c_pad=c_pad, n_rows=N, tile_n=tile_n, padded=padded)

    cost = pl.CostEstimate(
        flops=11 * N * c_pad,                 # sub, cmp, select, mul, add + 3 row reductions
        transcendentals=N * c_pad + N,        # exp per element + log per row
        bytes_accessed=N * c_pad * x.dtype.itemsize + N * 4 + num_tiles * 8 * _LANE * 4,
    )

    partials = pl.pallas_call(
        kernel,
        out_shape=jax.ShapeDtypeStruct((num_tiles, 8, _LANE), jnp.float32),
        grid_spec=pltpu.PrefetchScalarGridSpec(
            num_scalar_prefetch=0,
            grid=(num_tiles,),
            in_specs=[
                pl.BlockSpec((tile_n, c_pad), lambda i: (i, 0)),
                pl.BlockSpec((tile_n, 1), lambda i: (i, 0)),
            ],
            # One lane-aligned (8,128) partial-sum block per tile: no resident
            # accumulator, so the grid axis can be 'parallel' (2 TCs on v7x).
            out_specs=pl.BlockSpec((1, 8, _LANE), lambda i: (i, 0, 0)),
        ),
        compiler_params=pltpu.CompilerParams(
            dimension_semantics=("parallel",),
            vmem_limit_bytes=vmem_limit_bytes,
        ),
        cost_estimate=cost,
    )(x, tgt2d)

    # final batch mean (loss.mean() in the PyTorch module)
    return jnp.sum(partials[:, 0, 0]) / jnp.float32(N)


def _reference(x, target, smoothing=SMOOTHING):
    logprobs = jax.nn.log_softmax(x.astype(jnp.float32), axis=-1)
    nll = -jnp.take_along_axis(logprobs, target[:, None], axis=-1)[:, 0]
    smooth = -jnp.mean(logprobs, axis=-1)
    return jnp.mean((1.0 - smoothing) * nll + smoothing * smooth)


if __name__ == "__main__":
    key = jax.random.PRNGKey(0)
    kx, kt = jax.random.split(key)
    N, C = 16, 32                       # small shapes: batch=16, num_classes=32
    x = jax.random.normal(kx, (N, C), dtype=jnp.float32)
    target = jax.random.randint(kt, (N,), 0, C, dtype=jnp.int32)

    loss = label_smoothing_cross_entropy(x, target)
    loss = jax.block_until_ready(loss)

    ref = _reference(x, target)
    assert jnp.allclose(loss, ref, atol=1e-5, rtol=1e-5), (loss, ref)
    print("KERNEL_OK")
</pallas_src>

<mosaic_0001>
module attributes {stable_mosaic.version = 11 : i64} {
  func.func @_ls_ce_kernel(%arg0: i32, %arg1: memref<8x128xf32, #tpu.memory_space<vmem>>, %arg2: memref<8x1xi32, #tpu.memory_space<vmem>>, %arg3: memref<1x8x128xf32, #tpu.memory_space<vmem>>) attributes {dimension_semantics = [#tpu.dimension_semantics<parallel>], iteration_bounds = array<i64: 2>, scalar_prefetch = 0 : i64, scratch_operands = 0 : i64, tpu.core_type = #tpu.core_type<tc>, window_params = [{transform_indices = @transform_0, window_bounds = array<i64: 8, 128>}, {transform_indices = @transform_1, window_bounds = array<i64: 8, 1>}, {transform_indices = @transform_2, window_bounds = array<i64: 1, 8, 128>}]} {
    %c0 = arith.constant 0 : index
    %c0_0 = arith.constant 0 : index
    %0 = vector.load %arg1[%c0, %c0_0] : memref<8x128xf32, #tpu.memory_space<vmem>>, vector<8x128xf32>
    %cst = arith.constant dense<0xFF800000> : vector<8xf32>
    %1 = vector.multi_reduction <maximumf>, %0, %cst [1] : vector<8x128xf32> to vector<8xf32>
    %2 = vector.shape_cast %1 : vector<8xf32> to vector<8x1xf32>
    %3 = vector.broadcast %2 : vector<8x1xf32> to vector<8x128xf32>
    %4 = arith.subf %0, %3 : vector<8x128xf32>
    %5 = math.exp %4 : vector<8x128xf32>
    %cst_1 = arith.constant dense<0.000000e+00> : vector<8xf32>
    %6 = vector.multi_reduction <add>, %5, %cst_1 [1] : vector<8x128xf32> to vector<8xf32>
    %7 = vector.shape_cast %6 : vector<8xf32> to vector<8x1xf32>
    %8 = math.log %7 : vector<8x1xf32>
    %9 = tpu.iota {dimensions = array<i32: 1>} : vector<1x128xi32>
    %c32_i32 = arith.constant 32 : i32
    %10 = vector.broadcast %c32_i32 : i32 to vector<1x128xi32>
    %11 = arith.cmpi slt, %9, %10 : vector<1x128xi32>
    %cst_2 = arith.constant 3.125000e-03 : f32
    %cst_3 = arith.constant 0.000000e+00 : f32
    %12 = vector.broadcast %cst_2 : f32 to vector<1x128xf32>
    %13 = vector.broadcast %cst_3 : f32 to vector<1x128xf32>
    %14 = arith.select %11, %12, %13 : vector<1x128xi1>, vector<1x128xf32>
    %c0_4 = arith.constant 0 : index
    %c0_5 = arith.constant 0 : index
    %15 = vector.load %arg2[%c0_4, %c0_5] : memref<8x1xi32, #tpu.memory_space<vmem>>, vector<8x1xi32>
    %16 = vector.broadcast %9 : vector<1x128xi32> to vector<8x128xi32>
    %17 = vector.broadcast %15 : vector<8x1xi32> to vector<8x128xi32>
    %18 = arith.cmpi eq, %16, %17 : vector<8x128xi32>
    %cst_6 = arith.constant 0.899999976 : f32
    %cst_7 = arith.constant 0.000000e+00 : f32
    %19 = vector.broadcast %cst_6 : f32 to vector<8x128xf32>
    %20 = vector.broadcast %cst_7 : f32 to vector<8x128xf32>
    %21 = arith.select %18, %19, %20 : vector<8x128xi1>, vector<8x128xf32>
    %22 = vector.broadcast %14 : vector<1x128xf32> to vector<8x128xf32>
    %23 = arith.addf %21, %22 : vector<8x128xf32>
    %24 = arith.mulf %4, %23 : vector<8x128xf32>
    %cst_8 = arith.constant dense<0.000000e+00> : vector<8xf32>
    %25 = vector.multi_reduction <add>, %24, %cst_8 [1] : vector<8x128xf32> to vector<8xf32>
    %26 = vector.shape_cast %25 : vector<8xf32> to vector<8x1xf32>
    %27 = arith.subf %8, %26 : vector<8x1xf32>
    %c8_i32 = arith.constant 8 : i32
    %28 = arith.muli %arg0, %c8_i32 : i32
    %29 = tpu.iota {dimensions = array<i32: 0>} : vector<8x1xi32>
    %30 = vector.broadcast %28 : i32 to vector<8x1xi32>
    %31 = arith.addi %30, %29 : vector<8x1xi32>
    %c16_i32 = arith.constant 16 : i32
    %32 = vector.broadcast %c16_i32 : i32 to vector<8x1xi32>
    %33 = arith.cmpi slt, %31, %32 : vector<8x1xi32>
    %cst_9 = arith.constant 0.000000e+00 : f32
    %34 = vector.broadcast %cst_9 : f32 to vector<8x1xf32>
    %35 = arith.select %33, %27, %34 : vector<8x1xi1>, vector<8x1xf32>
    %36 = vector.shape_cast %35 : vector<8x1xf32> to vector<1x8x1xf32>
    %cst_10 = arith.constant dense<0.000000e+00> : vector<1xf32>
    %37 = vector.multi_reduction <add>, %36, %cst_10 [1, 2] : vector<1x8x1xf32> to vector<1xf32>
    %38 = vector.shape_cast %37 : vector<1xf32> to vector<1x1x1xf32>
    %39 = vector.extract %38[0, 0, 0] : f32 from vector<1x1x1xf32>
    %40 = vector.broadcast %39 : f32 to vector<1x8x128xf32>
    %c0_11 = arith.constant 0 : index
    %c0_12 = arith.constant 0 : index
    %c0_13 = arith.constant 0 : index
    %41 = vector.load %arg3[%c0_11, %c0_12, %c0_13] : memref<1x8x128xf32, #tpu.memory_space<vmem>>, vector<1x8x128xf32>
    tpu.vector_store %arg3[%c0_11, %c0_12, %c0_13], %40 {strides = array<i32>} : memref<1x8x128xf32, #tpu.memory_space<vmem>>, vector<1x8x128xf32>,
    return
  }
  func.func @transform_0(%arg0: i32) -> (i32, i32) {
    %c0_i32 = arith.constant 0 : i32
    %c0_i32_0 = arith.constant 0 : i32
    return %arg0, %c0_i32 : i32, i32
  }
  func.func @transform_1(%arg0: i32) -> (i32, i32) {
    %c0_i32 = arith.constant 0 : i32
    %c0_i32_0 = arith.constant 0 : i32
    return %arg0, %c0_i32 : i32, i32
  }
  func.func @transform_2(%arg0: i32) -> (i32, i32, i32) {
    %c0_i32 = arith.constant 0 : i32
    %c0_i32_0 = arith.constant 0 : i32
    %c0_i32_1 = arith.constant 0 : i32
    return %arg0, %c0_i32, %c0_i32_0 : i32, i32, i32
  }
}

</mosaic_0001>

<bundles_post_ra>
// kernel: tpu_custom_call.1
= control target key start
LH: loop header
LB: loop body
LE: loop exit
PB: predicated region body
PF: predicated region fallthrough
CT: control target
= control target key end

     0   :  { %7 = vsyncpa [#allocation3], 0  ;;  %s532_s0 = inlined_call_operand.vmem [shape: f32[16,128], index: 0, kind: input, shape index: {}]   ;;  %s533_s1 = inlined_call_operand.vmem [shape: s32[16,1], index: 1, kind: input, shape index: {}]   ;;  %s534_s2 = inlined_call_operand.hbm [shape: f32[2,8,128], index: 2, kind: output, shape index: {}]  }
   0x1   :  { %9 = vsyncpa [#allocation3 + $0x1], 0  ;;  %s428_s9 = smov 0   ;;  %s430_s10 = smov 0  }
   0x2   :  { %s432_s11 = smov 0   ;;  %s434_s12 = smov 0  }
   0x3 LB: > { %s449_s13 = sadd.s32 4294967295, %s408_s12   ;;  %s286_s14 = sadd.s32 4294967294, %s408_s12   ;;  %s408_s12 = sphi %s434_s12, %s540_s12   ;;  %s404_s11 = sphi %s432_s11, %s539_s11   ;;  %s400_s10 = sphi %s430_s10, %s538_s10   ;;  %s396_s9 = sphi %s428_s9, %s537_s9  }
   0x4   : > { %s453_s15 = sadd.s32 1, %s408_s12   ;;  %s74_s16 = sadd.s32 1, %s404_s11 }
   0x5   : > { %s71_s17 = ssub.s32 %s408_s12, %s453_s15  ;;  %p84_p0 = scmp.ne.s32.totalorder %s404_s11, %s400_s10 }
   0x6   : > { %p72_p1 = scmp.eq.s32.totalorder %s71_s17, 0  ;;  %p85_p2 = scmp.eq.s32.totalorder %s449_s13, 1 }
   0x7   : > { %p90_p3 = scmp.ne.s32.totalorder %s400_s10, %s396_s9  ;;  %p91_p4 = scmp.eq.s32.totalorder %s286_s14, 1 }
   0x8   : > { %s464_s18 = scalar_select %p72_p1, %s404_s11, %s74_s16  }
   0x9   : > { %p466_p5 = por %p85_p2, %p84_p0  ;;  %p470_p6 = por %p91_p4, %p90_p3 }
   0xa   : > { %p289_p7 = scmp.ge.s32.totalorder %s408_s12, 1  ;;  %p123_p8 = scmp.lt.s32.totalorder %s408_s12, 3 }
   0xc   : > { %p124_p9 = pnand %p289_p7, %p123_p8 }
   0xd   : > { %p148_p10 = scmp.lt.s32.totalorder (!%p124_p9), %s449_s13, 1  ;;  %v410_v0 = vmov (!%p124_p9), 0   ;;  %v166_v4 = vlaneseq (!%p124_p9)  ;;  %v411_v9 = vmov (!%p124_p9), 0.0   ;;  %s293_s29 = sshll.u32 (!%p124_p9), %s449_s13, 3  ;;  %vm188_vm3 = vcmask (!%p124_p9), 7168  }
   0xe   : > { %127 = sbr.rel (%p124_p9) target bundleno = 561 (0x231), region = 28  ;;  %341 = vset.pattern.permute.xlu0 (!%p124_p9), %v410_v0  ;;  %v184_v17 = vstv (!%p124_p9), %s293_s29  ;;  %s145_s30 = sand.u32 (!%p124_p9), 1, %s400_s10  }
   0xf   : > { %v167_v7 = vand.u32 (!%p124_p9), 127, %v166_v4  ;;  %v183_v16 = vshrl.u32 (!%p124_p9), %v166_v4, 7  ;;  %s290_s3 = sshll.u32 (!%p124_p9), %s145_s30, 3  ;;  %s295_s6 = sshll.u32 (!%p124_p9), %s449_s13, 7 }
  0x10   : > { %s147_s4 = scalar_lea.vmem (!%p124_p9), [#allocation2], %s290_s3  ;;  %s492_s16 = scalar_lea.hbm (!%p124_p9), %s534_s2, %s295_s6 }
  0x11   : > { %vm168_vm0 = vcmp.lt.s32.totalorder (!%p124_p9), %v167_v7, 32  ;;  %v185_v18 = vadd.s32 (!%p124_p9), %v184_v17, %v183_v16  ;;  %s215_s5 = sshll.u32 (!%p124_p9), %s147_s4, 4  ;;  %s202_s17 = scalar_lea.sflag (!%p124_p9), [#allocation3], %s145_s30  ;;  %s487_s5 = int_to_ptr.vmem [resolvable:$true] %s215_s5 }
  0x12   : > { %v169_v10 = vsel (!%p124_p9), %vm168_vm0, 0.003125, %v411_v9 }
  0x13   : > { %vm186_vm2 = vcmp.lt.s32.totalorder (!%p124_p9), %v185_v18, 16 }
  0x15   : > { %s149_s21 = scalar_select %p148_p10, %s449_s13, 1 }
  0x16   : > { %s412_s13 = smov [#allocation2]  }
  0x17   : > { %s291_s22 = sshll.u32 %s149_s21, 3  ;;  %s346_s21 = scalar_lea.vmem %s487_s5, 128 }
  0x18   : > { %s151_s25 = scalar_lea.vmem %s532_s0, %s291_s22  ;;  %s155_s28 = scalar_lea.vmem %s533_s1, %s291_s22 }
  0x19   : > { %v156_v1 = vld [vmem:[%s151_s25] sm:$0xff]  ;;  %p347_p11 = scmp.ne.s32.totalorder %s487_s5, %s346_s21  ;;  %s350_s22 = sshll.u32 %s412_s13, 4  ;;  %s351_s22 = int_to_ptr.vmem [resolvable:$false] %s350_s22 }
  0x1a   : > { %157 = vmax.xlane.f32.xlu0 %v156_v1  ;;  %v170_v2 = vld [vmem:[%s155_s28] sm:$0xff]  ;;  %s352_s23 = scalar_lea.vmem %s351_s22, 256  ;;  %p353_p0 = scmp.lt.s32.totalorder %s487_s5, %s351_s22 }
  0x1b   : > { %p348_p12 = pnand %p347_p11, %p466_p5  ;;  %p354_p1 = scmp.lt.s32.totalorder %s352_s23, %s346_s21 }
  0x1d   : > { %p349_p13 = pneg %p348_p12  ;;  %p355_p2 = por %p354_p1, %p353_p0 }
  0x1f   : > { %p356_p3 = pnand %p355_p2, %p349_p13 }
  0x30   : > { %172 = vperm.xlu0 %341, %v170_v2  }
  0xa7   : > { %v158_v3 = vpop.xlane.xlu0 %157 }
  0xa8   : > { %v159_v5 = vsub.f32 %v156_v1, %v158_v3 }
  0xaa   : > { %v160_v6 = vmul.f32 1.442695, %v159_v5 }
  0xac   : > { %342 = vpow2.f32 %v160_v6 }
  0xaf   : > { %v173_v8 = vpop.permute.xlu0 %172 }
  0xb0   : > { %vm174_vm1 = vcmp.eq.s32.totalorder %v167_v7, %v173_v8 }
  0xb1   : > { %v175_v11 = vsel %vm174_vm1, 0.9, %v411_v9 }
  0xb2   : > { %v176_v12 = vadd.f32 %v175_v11, %v169_v10 }
  0xb4   : > { %v177_v14 = vmul.f32 %v176_v12, %v159_v5 }
  0xb6   : > { %v343_v13 = vpop.eup %342 }
  0xb7   : > { %162 = vadd.xlane.f32.xlu1 %v343_v13 }
  0xbb   : > { %178 = vadd.xlane.f32.xlu1 %v177_v14 }
 0x144   : > { %v163_v15 = vpop.xlane.xlu1 %162 }
 0x145   : > { %344 = vlog2.f32 %v163_v15 }
 0x148   : > { %v179_v21 = vpop.xlane.xlu1 %178 }
 0x14f   : > { %v345_v19 = vpop.eup %344 }
 0x150   : > { %v165_v20 = vmul.f32 0.6931472, %v345_v19 }
 0x152   : > { %v180_v22 = vsub.f32 %v165_v20, %v179_v21 }
 0x154   : > { %v187_v23 = vsel %vm186_vm2, %v180_v22, 0.0 }
 0x155   : > { %v189_v24 = vsel %vm188_vm3, %v187_v23, 0.0 }
 0x156   : > { %190 = vadd.xlane.f32.xlu1 %v189_v24 }
 0x1e3   : > { %v191_v25 = vpop.xlane.xlu1 %190 }
 0x1e4   : > { %v192_v26 = vrot.slane %v191_v25, 4 }
 0x1e6   : > { %v193_v27 = vadd.f32 %v192_v26, %v191_v25 }
 0x1e8   : > { %v194_v28 = vrot.slane %v193_v27, 2 }
 0x1ea   : > { %v195_v29 = vadd.f32 %v194_v28, %v193_v27 }
 0x1ec   : > { %v196_v30 = vrot.slane %v195_v29, 1 }
 0x1ee   : > { %v197_v31 = vadd.f32 %v196_v30, %v195_v29 }
 0x1f0   : > { %298 = vpush %v197_v31 }
 0x221   : > { %s299_s7 = spop %298 }
 0x222   : > { %v199_v32 = vstv %s299_s7 }
 0x223   : > { %200 = vst [vmem:[%s147_s4] sm:$0xff] %v199_v32 }
 0x224   : > { %359 = shalt.err (!%p356_p3)
}
 0x225   : > { %s360_s24 = scalar_lea.hbm %s492_s16, 128  ;;  %s364_s27 = scalar_lea.hbm %s534_s2, 256 }
 0x226   : > { %p361_p4 = scmp.ne.s32.totalorder %s492_s16, %s360_s24  ;;  %p365_p9 = scmp.lt.u32.totalorder %s492_s16, %s534_s2 }
 0x227   : > { %p366_p10 = scmp.lt.u32.totalorder %s364_s27, %s360_s24  ;;  %p368_p12 = scmp.lt.u32.totalorder %s360_s24, %s492_s16 }
 0x228   : > { %p362_p7 = pnand %p361_p4, %p466_p5 }
 0x229   : > { %p367_p11 = por %p366_p10, %p365_p9 }
 0x22a   : > { %p363_p8 = pneg %p362_p7 }
 0x22b   : > { %p369_p13 = por %p368_p12, %p367_p11 }
 0x22d   : > { %p370_p0 = pnand %p369_p13, %p363_p8 }
 0x22f   : > { %373 = shalt.err (!%p370_p0)
}
 0x230   : > { %300 = dma.vmem_to_hbm [thread:$0]  (%p466_p5), %s487_s5, 128, %s492_s16, %s202_s17  }
 0x231 PF: > { %p306_p1 = scmp.ge.s32.totalorder %s408_s12, 2  ;;  %s227_s30 = sand.u32 1, %s396_s9  }
 0x232   : > { %s228_s3 = scalar_lea.sflag [#allocation3], %s227_s30 }
 0x233   : > { %p303_p2 = pnand %p306_p1, %p470_p6 }
 0x235   : > { %391 = dma.done.wait (!%p303_p2), %s228_s3, 128  }
 0x236   : > { %393 = vsyncadd (!%p303_p2), %s228_s3, 4294967168  ;;  %p12_p3 = scmp.ge.s32.totalorder %s453_s15, 4   ;;  %s537_s9 = smov %s400_s10 }
 0x237   : > { %s538_s10 = smov %s404_s11  ;;  %s539_s11 = smov %s464_s18 }
 0x238   : > { %s540_s12 = smov %s453_s15  ;;  %14 = sbr.rel (!%p12_p3) target bundleno = 3 (0x3), region = 66 }
 0x23f   :  { %233 = vsyncpa [#allocation3], 1 }
 0x240   :  { %235 = vsyncpa [#allocation3 + $0x1], 1 }

</bundles_post_ra>
